<compile_context>
chip_gen: v7x
topology: tpu7x:2x2x1
jax: 0.10.0
libtpu: 0.0.40
codegen_flags: <defaults>
</compile_context>

<pallas_src>
import jax
import jax.numpy as jnp
from jax.experimental import pallas as pl
from jax.experimental.pallas import tpu as pltpu


def _round_up(x, m):
    return (x + m - 1) // m * m


def _vmem_budget_bytes():
    # Generation-aware budgets: scoped limit ~3/4 of physical VMEM (capped),
    # per-grid-step working-set budget ~1/3 of the limit (leaves headroom for
    # double-buffering bookkeeping and compiler scratch).
    try:
        vmem = int(pltpu.get_tpu_info().vmem_capacity_bytes)
    except Exception:
        vmem = 64 * 1024 * 1024  # conservative v7x-sized fallback
    limit = min(int(vmem * 3 // 4), 96 * 1024 * 1024)
    budget = limit // 3
    return limit, budget


def _pick_tm(m_pad, bytes_per_row, budget):
    """Largest row tile: multiple of 8, divides m_pad, fits the VMEM budget,
    and (when there are enough rows) leaves >= 2 grid steps for v7x."""
    cap = m_pad if m_pad < 16 else m_pad // 2
    best = 8
    for cand in range(8, m_pad + 1, 8):
        if m_pad % cand != 0 or cand > cap:
            continue
        if cand * bytes_per_row <= budget:
            best = cand
    return best


def _scale_kernel(x_ref, g_ref, b_ref, o_ref):
    # Each row of the (rows, H*W) view is one (n, c) image plane; g/b carry
    # that row's gamma[c] / beta[c].  Pure VPU elementwise, lane-dense store.
    o_ref[...] = x_ref[...] * g_ref[...] + b_ref[...]


def scale_forward(x_nchw, gamma, beta):
    """Scale module forward: y[:, c] = x[:, c] * gamma[c] + beta[c] (NCHW)."""
    n, c, h, w = x_nchw.shape
    dt = x_nchw.dtype
    m = n * c            # one row per (batch, channel) plane
    l = h * w            # lane axis: whole image plane (lane-dense)

    # Free view: NCHW is contiguous as (N*C, H*W).  No transpose, no channel
    # padding -> no avoidable HBM traffic for the activation.
    x2d = x_nchw.reshape(m, l)
    g_rows = jnp.tile(gamma.astype(dt), n).reshape(m, 1)
    b_rows = jnp.tile(beta.astype(dt), n).reshape(m, 1)

    # Pad the (tiny) sublane axis to a multiple of 8 so every block obeys the
    # (8, 128) rule; the lane axis stays the full extent of the last dim.
    m_pad = _round_up(m, 8)
    if m_pad != m:
        x2d = jnp.pad(x2d, ((0, m_pad - m), (0, 0)))
        g_rows = jnp.pad(g_rows, ((0, m_pad - m), (0, 0)))
        b_rows = jnp.pad(b_rows, ((0, m_pad - m), (0, 0)))

    vmem_limit, tile_budget = _vmem_budget_bytes()
    itemsize = jnp.dtype(dt).itemsize
    # per row, double-buffered: x tile + out tile + gamma/beta elements
    bytes_per_row = (2 * l + 2) * itemsize * 2
    tm = _pick_tm(m_pad, bytes_per_row, tile_budget)
    grid = (m_pad // tm,)

    y2d = pl.pallas_call(
        _scale_kernel,
        grid=grid,
        in_specs=[pl.BlockSpec((tm, l), lambda i: (i, 0)),
                  pl.BlockSpec((tm, 1), lambda i: (i, 0)),
                  pl.BlockSpec((tm, 1), lambda i: (i, 0))],
        out_specs=pl.BlockSpec((tm, l), lambda i: (i, 0)),
        out_shape=jax.ShapeDtypeStruct((m_pad, l), dt),
        compiler_params=pltpu.CompilerParams(
            dimension_semantics=("parallel",),
            vmem_limit_bytes=vmem_limit),
    )(x2d, g_rows, b_rows)

    return y2d[:m].reshape(n, c, h, w)


def scale_ref(x_nchw, gamma, beta):
    return x_nchw * gamma[None, :, None, None] + beta[None, :, None, None]


if __name__ == "__main__":
    key = jax.random.PRNGKey(0)
    kx, kg, kb = jax.random.split(key, 3)
    N, C, H, W = 2, 4, 16, 16
    x = jax.random.normal(kx, (N, C, H, W), jnp.float32)      # NCHW
    gamma = jax.random.normal(kg, (C,), jnp.float32) + 1.0    # Scale.gamma
    beta = jax.random.normal(kb, (C,), jnp.float32) * 0.1     # Scale.beta

    fwd = jax.jit(scale_forward)
    out = jax.block_until_ready(fwd(x, gamma, beta))
    ref = jax.block_until_ready(scale_ref(x, gamma, beta))

    assert out.shape == (N, C, H, W), out.shape
    max_err = float(jnp.max(jnp.abs(out - ref)))
    if not bool(jnp.allclose(out, ref, rtol=1e-6, atol=1e-6)):
        raise AssertionError(f"kernel/reference mismatch, max abs err = {max_err}")
    print("KERNEL_OK")
</pallas_src>

<mosaic_0001>
module attributes {stable_mosaic.version = 11 : i64} {
  func.func @_scale_kernel(%arg0: i32, %arg1: memref<8x256xf32, #tpu.memory_space<vmem>>, %arg2: memref<8x1xf32, #tpu.memory_space<vmem>>, %arg3: memref<8x1xf32, #tpu.memory_space<vmem>>, %arg4: memref<8x256xf32, #tpu.memory_space<vmem>>) attributes {dimension_semantics = [#tpu.dimension_semantics<parallel>], iteration_bounds = array<i64: 1>, scalar_prefetch = 0 : i64, scratch_operands = 0 : i64, tpu.core_type = #tpu.core_type<tc>, window_params = [{transform_indices = @transform_0, window_bounds = array<i64: 8, 256>}, {transform_indices = @transform_1, window_bounds = array<i64: 8, 1>}, {transform_indices = @transform_2, window_bounds = array<i64: 8, 1>}, {transform_indices = @transform_3, window_bounds = array<i64: 8, 256>}]} {
    %c0 = arith.constant 0 : index
    %c0_0 = arith.constant 0 : index
    %0 = vector.load %arg1[%c0, %c0_0] : memref<8x256xf32, #tpu.memory_space<vmem>>, vector<8x256xf32>
    %c0_1 = arith.constant 0 : index
    %c0_2 = arith.constant 0 : index
    %1 = vector.load %arg2[%c0_1, %c0_2] : memref<8x1xf32, #tpu.memory_space<vmem>>, vector<8x1xf32>
    %2 = vector.broadcast %1 : vector<8x1xf32> to vector<8x256xf32>
    %3 = arith.mulf %0, %2 : vector<8x256xf32>
    %c0_3 = arith.constant 0 : index
    %c0_4 = arith.constant 0 : index
    %4 = vector.load %arg3[%c0_3, %c0_4] : memref<8x1xf32, #tpu.memory_space<vmem>>, vector<8x1xf32>
    %5 = vector.broadcast %4 : vector<8x1xf32> to vector<8x256xf32>
    %6 = arith.addf %3, %5 : vector<8x256xf32>
    %c0_5 = arith.constant 0 : index
    %c0_6 = arith.constant 0 : index
    %7 = vector.load %arg4[%c0_5, %c0_6] : memref<8x256xf32, #tpu.memory_space<vmem>>, vector<8x256xf32>
    tpu.vector_store %arg4[%c0_5, %c0_6], %6 {strides = array<i32>} : memref<8x256xf32, #tpu.memory_space<vmem>>, vector<8x256xf32>,
    return
  }
  func.func @transform_0(%arg0: i32) -> (i32, i32) {
    %c0_i32 = arith.constant 0 : i32
    %c0_i32_0 = arith.constant 0 : i32
    return %arg0, %c0_i32 : i32, i32
  }
  func.func @transform_1(%arg0: i32) -> (i32, i32) {
    %c0_i32 = arith.constant 0 : i32
    %c0_i32_0 = arith.constant 0 : i32
    return %arg0, %c0_i32 : i32, i32
  }
  func.func @transform_2(%arg0: i32) -> (i32, i32) {
    %c0_i32 = arith.constant 0 : i32
    %c0_i32_0 = arith.constant 0 : i32
    return %arg0, %c0_i32 : i32, i32
  }
  func.func @transform_3(%arg0: i32) -> (i32, i32) {
    %c0_i32 = arith.constant 0 : i32
    %c0_i32_0 = arith.constant 0 : i32
    return %arg0, %c0_i32 : i32, i32
  }
}

</mosaic_0001>

<bundles_post_ra>
// kernel: tile.1
= control target key start
LH: loop header
LB: loop body
LE: loop exit
PB: predicated region body
PF: predicated region fallthrough
CT: control target
= control target key end

     0   :  { %s34_s8 = smov 125   ;;  %vm7_vm0 = vcmask 7168   ;;  %s35_s11 = smov 126   ;;  %s61_s0 = inlined_call_operand.vmem [shape: f32[2,4], index: 0, kind: input, shape index: {}]   ;;  %s62_s1 = inlined_call_operand.vmem [shape: f32[8,1], index: 1, kind: output, shape index: {}]  }
   0x1   :  { %v4_v0 = vld [vmem:[%s61_s0] sm:$0x3]  ;;  %s33_s0 = smov 127  }
   0x2   :  { %5 = vst [vmem:[#allocation0] sm:$0x3] %v4_v0 }
   0x9   :  { %v9_v1 = vld [vmem:[#allocation0] sm:$0x3]  }
   0xa   :  { %v21_v2 = vld [vmem:[#allocation0] sm:$0x3]   ;;  %10 = vrot.lane.b32.xlu0 %v9_v1, %s33_s0 }
   0xb   :  { %22 = vrot.lane.b32.xlu1 %v21_v2, %s34_s8  ;;  %v6_v3 = vld [vmem:[#allocation0] sm:$0x3]  }
   0xc   :  { %v15_v4 = vld [vmem:[#allocation0] sm:$0x3]   ;;  %8 = vst.msk [vmem:[%s62_s1] ss:$4 sm:$0x3] %vm7_vm0, %v6_v3  }
   0xe   :  { %16 = vrot.lane.b32.xlu0 %v15_v4, %s35_s11 }
  0x7c   :  { %v11_v5 = vpop.permute.xlu0 %10  }
  0x7d   :  { %v23_v6 = vpop.permute.xlu1 %22   ;;  %27 = vst.msk [vmem:[%s62_s1 + $0x1] ss:$4 sm:$0x3] %vm7_vm0, %v11_v5  }
  0x7e   :  { %29 = vst.msk [vmem:[%s62_s1 + $0x3] ss:$4 sm:$0x3] %vm7_vm0, %v23_v6  }
  0x80   :  { %v17_v7 = vpop.permute.xlu0 %16  }
  0x81   :  { %28 = vst.msk [vmem:[%s62_s1 + $0x2] ss:$4 sm:$0x3] %vm7_vm0, %v17_v7  }

// kernel: tile.13
= control target key start
LH: loop header
LB: loop body
LE: loop exit
PB: predicated region body
PF: predicated region fallthrough
CT: control target
= control target key end

     0   :  { %s22_s0 = inlined_call_operand.vmem [shape: f32[4], index: 0, kind: input, shape index: {}]   ;;  %s23_s1 = inlined_call_operand.vmem [shape: f32[2,4], index: 1, kind: output, shape index: {}]  }
   0x1   :  { %v4_v0 = vld [vmem:[%s22_s0] ss:$0 sm:$0xff] }
   0x2   :  { %5 = vst [vmem:[%s23_s1] sm:$0x3] %v4_v0 }

// kernel: scale_forward.1
= control target key start
LH: loop header
LB: loop body
LE: loop exit
PB: predicated region body
PF: predicated region fallthrough
CT: control target
= control target key end

     0   :  { %v40_v0 = vmov 0   ;;  %s79_s1 = inlined_call_operand.vmem [shape: f32[8,1], index: 1, kind: input, shape index: {}]   ;;  %s80_s2 = inlined_call_operand.vmem [shape: f32[8,1], index: 2, kind: input, shape index: {}]   ;;  %s81_s0 = inlined_call_operand.vmem [shape: f32[8,256], index: 0, kind: input, shape index: {}]   ;;  %s82_s3 = inlined_call_operand.vmem [shape: f32[8,256], index: 3, kind: output, shape index: {}]  }
   0x1   :  { %39 = vset.pattern.permute.xlu0 %v40_v0  ;;  %v16_v1 = vld [vmem:[%s79_s1] sm:$0xff]  ;;  %v15_v5 = vld [vmem:[%s81_s0 + $0x8] sm:$0xff] }
   0x2   :  { %19 = vperm.xlu0 %39, %v16_v1   ;;  %v24_v2 = vld [vmem:[%s80_s2] sm:$0xff] }
   0x3   :  { %v14_v4 = vld [vmem:[%s81_s0] sm:$0xff] }
   0x6   :  { %27 = vperm.xlu0 %39, %v24_v2  }
  0x81   :  { %v20_v3 = vpop.permute.xlu0 %19 }
  0x82   :  { %v22_v6 = vmul.f32 %v20_v3, %v14_v4  ;;  %v23_v7 = vmul.f32 %v20_v3, %v15_v5 }
  0x85   :  { %v28_v8 = vpop.permute.xlu0 %27 }
  0x86   :  { %v30_v9 = vadd.f32 %v28_v8, %v22_v6  ;;  %v31_v10 = vadd.f32 %v28_v8, %v23_v7 }
  0x88   :  { %32 = vst [vmem:[%s82_s3] sm:$0xff] %v30_v9  ;;  %33 = vst [vmem:[%s82_s3 + $0x8] sm:$0xff] %v31_v10 }

</bundles_post_ra>
